<compile_context>
chip_gen: v5e
topology: v5e:2x2
jax: 0.10.0
libtpu: 0.0.40
codegen_flags: <defaults>
</compile_context>

<pallas_src>
import functools

import jax
import jax.numpy as jnp
import numpy as np
from jax import lax
from jax.experimental import pallas as pl
from jax.experimental.pallas import tpu as pltpu


# ---------------------------------------------------------------------------
# Shared conv body: lane-dense rolled-tap accumulation on the MXU.
#   x_flat   : (Cin, HW)  f32 value, image with H*W flat on the lane axis
#   w_ref    : (T, Cout, Cin) weight ref, tap-major (possibly scale-folded)
#   mask_ref : (T, HW)    f32 ref of 0/1 edge-validity masks
#   tap_plan : static tuple of (tap_index, lane_roll_shift, needs_mask)
# returns (Cout, HW) f32 accumulator.
# ---------------------------------------------------------------------------
def _conv_accumulate(x_flat, w_ref, mask_ref, tap_plan):
    acc = None
    for t, shift, needs_mask in tap_plan:          # static python unroll (1 or 9)
        tap = x_flat if shift == 0 else pltpu.roll(x_flat, shift, axis=1)
        if needs_mask:
            tap = tap * mask_ref[t:t + 1, :]       # (1, HW) broadcast, lane-dense
        part = jnp.dot(w_ref[t], tap, preferred_element_type=jnp.float32)
        acc = part if acc is None else acc + part
    return acc                                     # (Cout, HW)


# ---------------------------------------------------------------------------
# Kernel 1 (stats only): conv for one image, emit per-channel sum / sum-of-sq.
#   stats_ref : (1, Cout, 2)   [:, :, 0] = sum, [:, :, 1] = sum of squares
# ---------------------------------------------------------------------------
def conv_stats_kernel(x_ref, w_ref, mask_ref, stats_ref, *, tap_plan):
    acc = _conv_accumulate(x_ref[0], w_ref, mask_ref, tap_plan)   # (Cout, HW)
    stats_ref[0, :, 0:1] = jnp.sum(acc, axis=1, keepdims=True)
    stats_ref[0, :, 1:2] = jnp.sum(acc * acc, axis=1, keepdims=True)


# ---------------------------------------------------------------------------
# Kernel 2: recompute conv with BN-scale folded into the weights, add the
# (beta - mean*scale) shift as a bias, optional ReLU, single HBM write.
# ---------------------------------------------------------------------------
def conv_norm_relu_kernel(x_ref, w_ref, mask_ref, shift_ref, o_ref, *,
                          tap_plan, relu):
    Cout = w_ref.shape[1]
    HW = x_ref.shape[-1]
    acc = _conv_accumulate(x_ref[0], w_ref, mask_ref, tap_plan)   # (Cout, HW)
    out = acc + shift_ref[...]                                    # (Cout,1) bcast
    if relu:
        out = jnp.maximum(out, 0.0)
    o_ref[...] = out.reshape(1, Cout, HW)


# ---------------------------------------------------------------------------
# Wrapper: NCHW in / NCHW out, matching torch ConvBlock.forward semantics.
# ---------------------------------------------------------------------------
@functools.partial(jax.jit, static_argnames=("kernel_size", "relu", "eps"))
def conv_block_forward(x_nchw, weight_oihw, beta, *, kernel_size, relu=True,
                       eps=1e-5):
    assert kernel_size in (1, 3)
    pad = 1 if kernel_size == 3 else 0
    KH = KW = kernel_size
    T = KH * KW

    N, Cin, H, W = x_nchw.shape
    Cout = weight_oihw.shape[0]
    HW = H * W

    # Free, contiguous reshape: keep H*W flat on the lane axis end to end.
    x = x_nchw.astype(jnp.float32).reshape(N, Cin, HW)
    # OIHW -> (T, Cout, Cin), tap-major (matches tap_plan order). Tiny tensor.
    w_taps = jnp.transpose(weight_oihw.astype(jnp.float32),
                           (2, 3, 0, 1)).reshape(T, Cout, Cin)

    # Static per-tap plan: flat lane-roll shift + precomputed 0/1 edge masks.
    # tap(kh,kw)[p] = x[p + dh*W + dw] (masked at image edges), realized as a
    # roll by (-(dh*W+dw)) % HW  (np.roll convention: out[i] = x[i - shift]).
    hh = np.arange(H)[:, None]
    ww = np.arange(W)[None, :]
    mask_np = np.ones((T, HW), np.float32)
    tap_plan = []
    for kh in range(KH):
        for kw in range(KW):
            t = kh * KW + kw
            dh, dw = kh - pad, kw - pad
            shift = int((-(dh * W + dw)) % HW)
            needs_mask = not (dh == 0 and dw == 0)
            valid = ((hh + dh >= 0) & (hh + dh < H) &
                     (ww + dw >= 0) & (ww + dw < W))
            mask_np[t] = valid.reshape(HW).astype(np.float32)
            tap_plan.append((t, shift, needs_mask))
    tap_plan = tuple(tap_plan)
    masks = jnp.asarray(mask_np)

    conv_flops_per_image = 2 * Cout * T * Cin * HW

    # --- pass 1: per-image per-channel conv statistics (no activation write) -
    stats = pl.pallas_call(
        functools.partial(conv_stats_kernel, tap_plan=tap_plan),
        out_shape=jax.ShapeDtypeStruct((N, Cout, 2), jnp.float32),
        grid=(N,),
        in_specs=[
            pl.BlockSpec((1, Cin, HW), lambda n: (n, 0, 0)),
            pl.BlockSpec((T, Cout, Cin), lambda n: (0, 0, 0)),
            pl.BlockSpec((T, HW), lambda n: (0, 0)),
        ],
        out_specs=pl.BlockSpec((1, Cout, 2), lambda n: (n, 0, 0)),
        compiler_params=pltpu.CompilerParams(
            dimension_semantics=("parallel",)),
        cost_estimate=pl.CostEstimate(
            flops=N * conv_flops_per_image,
            transcendentals=0,
            bytes_accessed=4 * (N * Cin * HW + T * Cout * Cin + T * HW
                                + N * Cout * 2)),
    )(x, w_taps, masks)

    # --- tiny per-channel finalization (N*Cout*2 floats) in plain JAX --------
    # NOTE: E[x^2]-E[x]^2 in f32 is fine at these scales; a shifted/compensated
    # formulation would be safer for production-scale activations.
    count = float(N * HW)
    tot = jnp.sum(stats, axis=0)                     # (Cout, 2)
    mean = tot[:, 0] / count
    ex2 = tot[:, 1] / count
    var = jnp.maximum(ex2 - mean * mean, 0.0)        # biased var (BN training)
    scale = lax.rsqrt(var + eps)                     # (Cout,)
    shift = beta.astype(jnp.float32) - mean * scale  # (Cout,)
    w_scaled = w_taps * scale[None, :, None]         # fold BN scale into conv
    shift2 = shift.reshape(Cout, 1)

    # --- pass 2: recompute conv (scaled weights) + shift + ReLU, write once --
    y = pl.pallas_call(
        functools.partial(conv_norm_relu_kernel, tap_plan=tap_plan, relu=relu),
        out_shape=jax.ShapeDtypeStruct((N, Cout, HW), jnp.float32),
        grid=(N,),
        in_specs=[
            pl.BlockSpec((1, Cin, HW), lambda n: (n, 0, 0)),
            pl.BlockSpec((T, Cout, Cin), lambda n: (0, 0, 0)),
            pl.BlockSpec((T, HW), lambda n: (0, 0)),
            pl.BlockSpec((Cout, 1), lambda n: (0, 0)),
        ],
        out_specs=pl.BlockSpec((1, Cout, HW), lambda n: (n, 0, 0)),
        compiler_params=pltpu.CompilerParams(
            dimension_semantics=("parallel",)),
        cost_estimate=pl.CostEstimate(
            flops=N * (conv_flops_per_image + 2 * Cout * HW),
            transcendentals=0,
            bytes_accessed=4 * (N * Cin * HW + N * Cout * HW
                                + T * Cout * Cin + T * HW + Cout)),
    )(x, w_scaled, masks, shift2)

    # (N, Cout, H*W) -> (N, Cout, H, W): contiguous reshape, no data movement.
    return y.reshape(N, Cout, H, W)


# ---------------------------------------------------------------------------
# Pure-JAX reference for a correctness check.
# ---------------------------------------------------------------------------
def conv_block_reference(x_nchw, weight_oihw, beta, *, kernel_size, relu=True,
                         eps=1e-5):
    pad = 1 if kernel_size == 3 else 0
    y = lax.conv_general_dilated(
        x_nchw.astype(jnp.float32), weight_oihw.astype(jnp.float32),
        window_strides=(1, 1), padding=[(pad, pad), (pad, pad)],
        dimension_numbers=("NCHW", "OIHW", "NCHW"))
    mean = jnp.mean(y, axis=(0, 2, 3), keepdims=True)
    var = jnp.mean((y - mean) ** 2, axis=(0, 2, 3), keepdims=True)
    y = (y - mean) * lax.rsqrt(var + eps)
    y = y + beta.reshape(1, -1, 1, 1)
    if relu:
        y = jnp.maximum(y, 0.0)
    return y


if __name__ == "__main__":
    # Small, deterministic setup consistent with the module.
    batch, in_channels, out_channels, spatial = 2, 4, 8, 16
    kernel_size = 3
    relu = True

    key = jax.random.PRNGKey(0)
    k_x, k_w = jax.random.split(key)

    x = jax.random.normal(k_x, (batch, in_channels, spatial, spatial),
                          dtype=jnp.float32)

    # kaiming_normal_(mode='fan_out', nonlinearity='relu'):
    #   std = sqrt(2 / fan_out), fan_out = out_channels * k * k
    fan_out = out_channels * kernel_size * kernel_size
    std = float(np.sqrt(2.0 / fan_out))
    weight = std * jax.random.normal(
        k_w, (out_channels, in_channels, kernel_size, kernel_size),
        dtype=jnp.float32)

    beta = jnp.zeros((out_channels,), dtype=jnp.float32)  # nn.Parameter(zeros)

    out = conv_block_forward(x, weight, beta, kernel_size=kernel_size,
                             relu=relu)
    out = jax.block_until_ready(out)

    ref = conv_block_reference(x, weight, beta, kernel_size=kernel_size,
                               relu=relu)
    np.testing.assert_allclose(np.asarray(out), np.asarray(ref),
                               rtol=1e-4, atol=1e-4)

    print("KERNEL_OK")
</pallas_src>

<mosaic_0001>
module attributes {stable_mosaic.version = 11 : i64} {
  func.func @conv_stats_kernel(%arg0: i32, %arg1: memref<1x4x256xf32, #tpu.memory_space<vmem>>, %arg2: memref<9x8x4xf32, #tpu.memory_space<vmem>>, %arg3: memref<9x256xf32, #tpu.memory_space<vmem>>, %arg4: memref<1x8x2xf32, #tpu.memory_space<vmem>>) attributes {dimension_semantics = [#tpu.dimension_semantics<parallel>], iteration_bounds = array<i64: 2>, scalar_prefetch = 0 : i64, scratch_operands = 0 : i64, tpu.core_type = #tpu.core_type<tc>, window_params = [{transform_indices = @transform_0, window_bounds = array<i64: 1, 4, 256>}, {pipeline_mode = #tpu.pipeline_mode<synchronous>, transform_indices = @transform_1, window_bounds = array<i64: 9, 8, 4>}, {pipeline_mode = #tpu.pipeline_mode<synchronous>, transform_indices = @transform_2, window_bounds = array<i64: 9, 256>}, {transform_indices = @transform_3, window_bounds = array<i64: 1, 8, 2>}]} {
    %c0 = arith.constant 0 : index
    %c0_0 = arith.constant 0 : index
    %c0_1 = arith.constant 0 : index
    %0 = vector.load %arg1[%c0, %c0_0, %c0_1] : memref<1x4x256xf32, #tpu.memory_space<vmem>>, vector<1x4x256xf32>
    %1 = vector.shape_cast %0 : vector<1x4x256xf32> to vector<4x256xf32>
    %c17_i32 = arith.constant 17 : i32
    %2 = tpu.dynamic_rotate %1 by %c17_i32 dim 1 : vector<4x256xf32>, i32 -> vector<4x256xf32>
    %c0_2 = arith.constant 0 : index
    %c0_3 = arith.constant 0 : index
    %3 = vector.load %arg3[%c0_2, %c0_3] : memref<9x256xf32, #tpu.memory_space<vmem>>, vector<1x256xf32>
    %4 = vector.broadcast %3 : vector<1x256xf32> to vector<4x256xf32>
    %5 = arith.mulf %2, %4 : vector<4x256xf32>
    %c0_4 = arith.constant 0 : index
    %c0_5 = arith.constant 0 : index
    %c0_6 = arith.constant 0 : index
    %6 = vector.load %arg2[%c0_4, %c0_5, %c0_6] : memref<9x8x4xf32, #tpu.memory_space<vmem>>, vector<1x8x4xf32>
    %7 = vector.shape_cast %6 : vector<1x8x4xf32> to vector<8x4xf32>
    %cst = arith.constant dense<0.000000e+00> : vector<8x256xf32>
    %8 = tpu.matmul %7, %5, %cst {dimension_numbers = #tpu.dot_dimension_numbers<[1], [0], [0], [1], [0, 0, 1, 1], [], []>} : vector<8x4xf32>, vector<4x256xf32>, vector<8x256xf32> -> vector<8x256xf32>
    %c16_i32 = arith.constant 16 : i32
    %9 = tpu.dynamic_rotate %1 by %c16_i32 dim 1 : vector<4x256xf32>, i32 -> vector<4x256xf32>
    %c1 = arith.constant 1 : index
    %c0_7 = arith.constant 0 : index
    %10 = vector.load %arg3[%c1, %c0_7] : memref<9x256xf32, #tpu.memory_space<vmem>>, vector<1x256xf32>
    %11 = vector.broadcast %10 : vector<1x256xf32> to vector<4x256xf32>
    %12 = arith.mulf %9, %11 : vector<4x256xf32>
    %c1_8 = arith.constant 1 : index
    %c0_9 = arith.constant 0 : index
    %c0_10 = arith.constant 0 : index
    %13 = vector.load %arg2[%c1_8, %c0_9, %c0_10] : memref<9x8x4xf32, #tpu.memory_space<vmem>>, vector<1x8x4xf32>
    %14 = vector.shape_cast %13 : vector<1x8x4xf32> to vector<8x4xf32>
    %cst_11 = arith.constant dense<0.000000e+00> : vector<8x256xf32>
    %15 = tpu.matmul %14, %12, %cst_11 {dimension_numbers = #tpu.dot_dimension_numbers<[1], [0], [0], [1], [0, 0, 1, 1], [], []>} : vector<8x4xf32>, vector<4x256xf32>, vector<8x256xf32> -> vector<8x256xf32>
    %16 = arith.addf %8, %15 : vector<8x256xf32>
    %c15_i32 = arith.constant 15 : i32
    %17 = tpu.dynamic_rotate %1 by %c15_i32 dim 1 : vector<4x256xf32>, i32 -> vector<4x256xf32>
    %c2 = arith.constant 2 : index
    %c0_12 = arith.constant 0 : index
    %18 = vector.load %arg3[%c2, %c0_12] : memref<9x256xf32, #tpu.memory_space<vmem>>, vector<1x256xf32>
    %19 = vector.broadcast %18 : vector<1x256xf32> to vector<4x256xf32>
    %20 = arith.mulf %17, %19 : vector<4x256xf32>
    %c2_13 = arith.constant 2 : index
    %c0_14 = arith.constant 0 : index
    %c0_15 = arith.constant 0 : index
    %21 = vector.load %arg2[%c2_13, %c0_14, %c0_15] : memref<9x8x4xf32, #tpu.memory_space<vmem>>, vector<1x8x4xf32>
    %22 = vector.shape_cast %21 : vector<1x8x4xf32> to vector<8x4xf32>
    %cst_16 = arith.constant dense<0.000000e+00> : vector<8x256xf32>
    %23 = tpu.matmul %22, %20, %cst_16 {dimension_numbers = #tpu.dot_dimension_numbers<[1], [0], [0], [1], [0, 0, 1, 1], [], []>} : vector<8x4xf32>, vector<4x256xf32>, vector<8x256xf32> -> vector<8x256xf32>
    %24 = arith.addf %16, %23 : vector<8x256xf32>
    %c1_i32 = arith.constant 1 : i32
    %25 = tpu.dynamic_rotate %1 by %c1_i32 dim 1 : vector<4x256xf32>, i32 -> vector<4x256xf32>
    %c3 = arith.constant 3 : index
    %c0_17 = arith.constant 0 : index
    %26 = vector.load %arg3[%c3, %c0_17] : memref<9x256xf32, #tpu.memory_space<vmem>>, vector<1x256xf32>
    %27 = vector.broadcast %26 : vector<1x256xf32> to vector<4x256xf32>
    %28 = arith.mulf %25, %27 : vector<4x256xf32>
    %c3_18 = arith.constant 3 : index
    %c0_19 = arith.constant 0 : index
    %c0_20 = arith.constant 0 : index
    %29 = vector.load %arg2[%c3_18, %c0_19, %c0_20] : memref<9x8x4xf32, #tpu.memory_space<vmem>>, vector<1x8x4xf32>
    %30 = vector.shape_cast %29 : vector<1x8x4xf32> to vector<8x4xf32>
    %cst_21 = arith.constant dense<0.000000e+00> : vector<8x256xf32>
    %31 = tpu.matmul %30, %28, %cst_21 {dimension_numbers = #tpu.dot_dimension_numbers<[1], [0], [0], [1], [0, 0, 1, 1], [], []>} : vector<8x4xf32>, vector<4x256xf32>, vector<8x256xf32> -> vector<8x256xf32>
    %32 = arith.addf %24, %31 : vector<8x256xf32>
    %c4 = arith.constant 4 : index
    %c0_22 = arith.constant 0 : index
    %c0_23 = arith.constant 0 : index
    %33 = vector.load %arg2[%c4, %c0_22, %c0_23] : memref<9x8x4xf32, #tpu.memory_space<vmem>>, vector<1x8x4xf32>
    %34 = vector.shape_cast %33 : vector<1x8x4xf32> to vector<8x4xf32>
    %cst_24 = arith.constant dense<0.000000e+00> : vector<8x256xf32>
    %35 = tpu.matmul %34, %1, %cst_24 {dimension_numbers = #tpu.dot_dimension_numbers<[1], [0], [0], [1], [0, 0, 1, 1], [], []>} : vector<8x4xf32>, vector<4x256xf32>, vector<8x256xf32> -> vector<8x256xf32>
    %36 = arith.addf %32, %35 : vector<8x256xf32>
    %c255_i32 = arith.constant 255 : i32
    %37 = tpu.dynamic_rotate %1 by %c255_i32 dim 1 : vector<4x256xf32>, i32 -> vector<4x256xf32>
    %c5 = arith.constant 5 : index
    %c0_25 = arith.constant 0 : index
    %38 = vector.load %arg3[%c5, %c0_25] : memref<9x256xf32, #tpu.memory_space<vmem>>, vector<1x256xf32>
    %39 = vector.broadcast %38 : vector<1x256xf32> to vector<4x256xf32>
    %40 = arith.mulf %37, %39 : vector<4x256xf32>
    %c5_26 = arith.constant 5 : index
    %c0_27 = arith.constant 0 : index
    %c0_28 = arith.constant 0 : index
    %41 = vector.load %arg2[%c5_26, %c0_27, %c0_28] : memref<9x8x4xf32, #tpu.memory_space<vmem>>, vector<1x8x4xf32>
    %42 = vector.shape_cast %41 : vector<1x8x4xf32> to vector<8x4xf32>
    %cst_29 = arith.constant dense<0.000000e+00> : vector<8x256xf32>
    %43 = tpu.matmul %42, %40, %cst_29 {dimension_numbers = #tpu.dot_dimension_numbers<[1], [0], [0], [1], [0, 0, 1, 1], [], []>} : vector<8x4xf32>, vector<4x256xf32>, vector<8x256xf32> -> vector<8x256xf32>
    %44 = arith.addf %36, %43 : vector<8x256xf32>
    %c241_i32 = arith.constant 241 : i32
    %45 = tpu.dynamic_rotate %1 by %c241_i32 dim 1 : vector<4x256xf32>, i32 -> vector<4x256xf32>
    %c6 = arith.constant 6 : index
    %c0_30 = arith.constant 0 : index
    %46 = vector.load %arg3[%c6, %c0_30] : memref<9x256xf32, #tpu.memory_space<vmem>>, vector<1x256xf32>
    %47 = vector.broadcast %46 : vector<1x256xf32> to vector<4x256xf32>
    %48 = arith.mulf %45, %47 : vector<4x256xf32>
    %c6_31 = arith.constant 6 : index
    %c0_32 = arith.constant 0 : index
    %c0_33 = arith.constant 0 : index
    %49 = vector.load %arg2[%c6_31, %c0_32, %c0_33] : memref<9x8x4xf32, #tpu.memory_space<vmem>>, vector<1x8x4xf32>
    %50 = vector.shape_cast %49 : vector<1x8x4xf32> to vector<8x4xf32>
    %cst_34 = arith.constant dense<0.000000e+00> : vector<8x256xf32>
    %51 = tpu.matmul %50, %48, %cst_34 {dimension_numbers = #tpu.dot_dimension_numbers<[1], [0], [0], [1], [0, 0, 1, 1], [], []>} : vector<8x4xf32>, vector<4x256xf32>, vector<8x256xf32> -> vector<8x256xf32>
    %52 = arith.addf %44, %51 : vector<8x256xf32>
    %c240_i32 = arith.constant 240 : i32
    %53 = tpu.dynamic_rotate %1 by %c240_i32 dim 1 : vector<4x256xf32>, i32 -> vector<4x256xf32>
    %c7 = arith.constant 7 : index
    %c0_35 = arith.constant 0 : index
    %54 = vector.load %arg3[%c7, %c0_35] : memref<9x256xf32, #tpu.memory_space<vmem>>, vector<1x256xf32>
    %55 = vector.broadcast %54 : vector<1x256xf32> to vector<4x256xf32>
    %56 = arith.mulf %53, %55 : vector<4x256xf32>
    %c7_36 = arith.constant 7 : index
    %c0_37 = arith.constant 0 : index
    %c0_38 = arith.constant 0 : index
    %57 = vector.load %arg2[%c7_36, %c0_37, %c0_38] : memref<9x8x4xf32, #tpu.memory_space<vmem>>, vector<1x8x4xf32>
    %58 = vector.shape_cast %57 : vector<1x8x4xf32> to vector<8x4xf32>
    %cst_39 = arith.constant dense<0.000000e+00> : vector<8x256xf32>
    %59 = tpu.matmul %58, %56, %cst_39 {dimension_numbers = #tpu.dot_dimension_numbers<[1], [0], [0], [1], [0, 0, 1, 1], [], []>} : vector<8x4xf32>, vector<4x256xf32>, vector<8x256xf32> -> vector<8x256xf32>
    %60 = arith.addf %52, %59 : vector<8x256xf32>
    %c239_i32 = arith.constant 239 : i32
    %61 = tpu.dynamic_rotate %1 by %c239_i32 dim 1 : vector<4x256xf32>, i32 -> vector<4x256xf32>
    %c8 = arith.constant 8 : index
    %c0_40 = arith.constant 0 : index
    %62 = vector.load %arg3[%c8, %c0_40] : memref<9x256xf32, #tpu.memory_space<vmem>>, vector<1x256xf32>
    %63 = vector.broadcast %62 : vector<1x256xf32> to vector<4x256xf32>
    %64 = arith.mulf %61, %63 : vector<4x256xf32>
    %c8_41 = arith.constant 8 : index
    %c0_42 = arith.constant 0 : index
    %c0_43 = arith.constant 0 : index
    %65 = vector.load %arg2[%c8_41, %c0_42, %c0_43] : memref<9x8x4xf32, #tpu.memory_space<vmem>>, vector<1x8x4xf32>
    %66 = vector.shape_cast %65 : vector<1x8x4xf32> to vector<8x4xf32>
    %cst_44 = arith.constant dense<0.000000e+00> : vector<8x256xf32>
    %67 = tpu.matmul %66, %64, %cst_44 {dimension_numbers = #tpu.dot_dimension_numbers<[1], [0], [0], [1], [0, 0, 1, 1], [], []>} : vector<8x4xf32>, vector<4x256xf32>, vector<8x256xf32> -> vector<8x256xf32>
    %68 = arith.addf %60, %67 : vector<8x256xf32>
    %cst_45 = arith.constant dense<0.000000e+00> : vector<8xf32>
    %69 = vector.multi_reduction <add>, %68, %cst_45 [1] : vector<8x256xf32> to vector<8xf32>
    %70 = vector.shape_cast %69 : vector<8xf32> to vector<8x1xf32>
    %c0_46 = arith.constant 0 : index
    %c0_47 = arith.constant 0 : index
    %c0_48 = arith.constant 0 : index
    %71 = vector.load %arg4[%c0_46, %c0_47, %c0_48] : memref<1x8x2xf32, #tpu.memory_space<vmem>>, vector<1x8x1xf32>
    %72 = vector.shape_cast %71 : vector<1x8x1xf32> to vector<8x1xf32>
    %73 = vector.shape_cast %70 : vector<8x1xf32> to vector<1x8x1xf32>
    tpu.vector_store %arg4[%c0_46, %c0_47, %c0_48], %73 {strides = array<i32>} : memref<1x8x2xf32, #tpu.memory_space<vmem>>, vector<1x8x1xf32>,
    %74 = arith.mulf %68, %68 : vector<8x256xf32>
    %cst_49 = arith.constant dense<0.000000e+00> : vector<8xf32>
    %75 = vector.multi_reduction <add>, %74, %cst_49 [1] : vector<8x256xf32> to vector<8xf32>
    %76 = vector.shape_cast %75 : vector<8xf32> to vector<8x1xf32>
    %c0_50 = arith.constant 0 : index
    %c0_51 = arith.constant 0 : index
    %c1_52 = arith.constant 1 : index
    %77 = vector.load %arg4[%c0_50, %c0_51, %c1_52] : memref<1x8x2xf32, #tpu.memory_space<vmem>>, vector<1x8x1xf32>
    %78 = vector.shape_cast %77 : vector<1x8x1xf32> to vector<8x1xf32>
    %79 = vector.shape_cast %76 : vector<8x1xf32> to vector<1x8x1xf32>
    tpu.vector_store %arg4[%c0_50, %c0_51, %c1_52], %79 {strides = array<i32>} : memref<1x8x2xf32, #tpu.memory_space<vmem>>, vector<1x8x1xf32>,
    return
  }
  func.func @transform_0(%arg0: i32) -> (i32, i32, i32) {
    %c0_i32 = arith.constant 0 : i32
    %c0_i32_0 = arith.constant 0 : i32
    %c0_i32_1 = arith.constant 0 : i32
    return %arg0, %c0_i32, %c0_i32_0 : i32, i32, i32
  }
  func.func @transform_1(%arg0: i32) -> (i32, i32, i32) {
    %c0_i32 = arith.constant 0 : i32
    %c0_i32_0 = arith.constant 0 : i32
    %c0_i32_1 = arith.constant 0 : i32
    %c0_i32_2 = arith.constant 0 : i32
    return %c0_i32, %c0_i32_0, %c0_i32_1 : i32, i32, i32
  }
  func.func @transform_2(%arg0: i32) -> (i32, i32) {
    %c0_i32 = arith.constant 0 : i32
    %c0_i32_0 = arith.constant 0 : i32
    %c0_i32_1 = arith.constant 0 : i32
    return %c0_i32, %c0_i32_0 : i32, i32
  }
  func.func @transform_3(%arg0: i32) -> (i32, i32, i32) {
    %c0_i32 = arith.constant 0 : i32
    %c0_i32_0 = arith.constant 0 : i32
    %c0_i32_1 = arith.constant 0 : i32
    return %arg0, %c0_i32, %c0_i32_0 : i32, i32, i32
  }
}

module attributes {stable_mosaic.version = 11 : i64} {
  func.func @conv_norm_relu_kernel(%arg0: i32, %arg1: memref<1x4x256xf32, #tpu.memory_space<vmem>>, %arg2: memref<9x8x4xf32, #tpu.memory_space<vmem>>, %arg3: memref<9x256xf32, #tpu.memory_space<vmem>>, %arg4: memref<8x1xf32, #tpu.memory_space<vmem>>, %arg5: memref<1x8x256xf32, #tpu.memory_space<vmem>>) attributes {dimension_semantics = [#tpu.dimension_semantics<parallel>], iteration_bounds = array<i64: 2>, scalar_prefetch = 0 : i64, scratch_operands = 0 : i64, tpu.core_type = #tpu.core_type<tc>, window_params = [{transform_indices = @transform_0, window_bounds = array<i64: 1, 4, 256>}, {pipeline_mode = #tpu.pipeline_mode<synchronous>, transform_indices = @transform_1, window_bounds = array<i64: 9, 8, 4>}, {pipeline_mode = #tpu.pipeline_mode<synchronous>, transform_indices = @transform_2, window_bounds = array<i64: 9, 256>}, {pipeline_mode = #tpu.pipeline_mode<synchronous>, transform_indices = @transform_3, window_bounds = array<i64: 8, 1>}, {transform_indices = @transform_4, window_bounds = array<i64: 1, 8, 256>}]} {
    %c0 = arith.constant 0 : index
    %c0_0 = arith.constant 0 : index
    %c0_1 = arith.constant 0 : index
    %0 = vector.load %arg1[%c0, %c0_0, %c0_1] : memref<1x4x256xf32, #tpu.memory_space<vmem>>, vector<1x4x256xf32>
    %1 = vector.shape_cast %0 : vector<1x4x256xf32> to vector<4x256xf32>
    %c17_i32 = arith.constant 17 : i32
    %2 = tpu.dynamic_rotate %1 by %c17_i32 dim 1 : vector<4x256xf32>, i32 -> vector<4x256xf32>
    %c0_2 = arith.constant 0 : index
    %c0_3 = arith.constant 0 : index
    %3 = vector.load %arg3[%c0_2, %c0_3] : memref<9x256xf32, #tpu.memory_space<vmem>>, vector<1x256xf32>
    %4 = vector.broadcast %3 : vector<1x256xf32> to vector<4x256xf32>
    %5 = arith.mulf %2, %4 : vector<4x256xf32>
    %c0_4 = arith.constant 0 : index
    %c0_5 = arith.constant 0 : index
    %c0_6 = arith.constant 0 : index
    %6 = vector.load %arg2[%c0_4, %c0_5, %c0_6] : memref<9x8x4xf32, #tpu.memory_space<vmem>>, vector<1x8x4xf32>
    %7 = vector.shape_cast %6 : vector<1x8x4xf32> to vector<8x4xf32>
    %cst = arith.constant dense<0.000000e+00> : vector<8x256xf32>
    %8 = tpu.matmul %7, %5, %cst {dimension_numbers = #tpu.dot_dimension_numbers<[1], [0], [0], [1], [0, 0, 1, 1], [], []>} : vector<8x4xf32>, vector<4x256xf32>, vector<8x256xf32> -> vector<8x256xf32>
    %c16_i32 = arith.constant 16 : i32
    %9 = tpu.dynamic_rotate %1 by %c16_i32 dim 1 : vector<4x256xf32>, i32 -> vector<4x256xf32>
    %c1 = arith.constant 1 : index
    %c0_7 = arith.constant 0 : index
    %10 = vector.load %arg3[%c1, %c0_7] : memref<9x256xf32, #tpu.memory_space<vmem>>, vector<1x256xf32>
    %11 = vector.broadcast %10 : vector<1x256xf32> to vector<4x256xf32>
    %12 = arith.mulf %9, %11 : vector<4x256xf32>
    %c1_8 = arith.constant 1 : index
    %c0_9 = arith.constant 0 : index
    %c0_10 = arith.constant 0 : index
    %13 = vector.load %arg2[%c1_8, %c0_9, %c0_10] : memref<9x8x4xf32, #tpu.memory_space<vmem>>, vector<1x8x4xf32>
    %14 = vector.shape_cast %13 : vector<1x8x4xf32> to vector<8x4xf32>
    %cst_11 = arith.constant dense<0.000000e+00> : vector<8x256xf32>
    %15 = tpu.matmul %14, %12, %cst_11 {dimension_numbers = #tpu.dot_dimension_numbers<[1], [0], [0], [1], [0, 0, 1, 1], [], []>} : vector<8x4xf32>, vector<4x256xf32>, vector<8x256xf32> -> vector<8x256xf32>
    %16 = arith.addf %8, %15 : vector<8x256xf32>
    %c15_i32 = arith.constant 15 : i32
    %17 = tpu.dynamic_rotate %1 by %c15_i32 dim 1 : vector<4x256xf32>, i32 -> vector<4x256xf32>
    %c2 = arith.constant 2 : index
    %c0_12 = arith.constant 0 : index
    %18 = vector.load %arg3[%c2, %c0_12] : memref<9x256xf32, #tpu.memory_space<vmem>>, vector<1x256xf32>
    %19 = vector.broadcast %18 : vector<1x256xf32> to vector<4x256xf32>
    %20 = arith.mulf %17, %19 : vector<4x256xf32>
    %c2_13 = arith.constant 2 : index
    %c0_14 = arith.constant 0 : index
    %c0_15 = arith.constant 0 : index
    %21 = vector.load %arg2[%c2_13, %c0_14, %c0_15] : memref<9x8x4xf32, #tpu.memory_space<vmem>>, vector<1x8x4xf32>
    %22 = vector.shape_cast %21 : vector<1x8x4xf32> to vector<8x4xf32>
    %cst_16 = arith.constant dense<0.000000e+00> : vector<8x256xf32>
    %23 = tpu.matmul %22, %20, %cst_16 {dimension_numbers = #tpu.dot_dimension_numbers<[1], [0], [0], [1], [0, 0, 1, 1], [], []>} : vector<8x4xf32>, vector<4x256xf32>, vector<8x256xf32> -> vector<8x256xf32>
    %24 = arith.addf %16, %23 : vector<8x256xf32>
    %c1_i32 = arith.constant 1 : i32
    %25 = tpu.dynamic_rotate %1 by %c1_i32 dim 1 : vector<4x256xf32>, i32 -> vector<4x256xf32>
    %c3 = arith.constant 3 : index
    %c0_17 = arith.constant 0 : index
    %26 = vector.load %arg3[%c3, %c0_17] : memref<9x256xf32, #tpu.memory_space<vmem>>, vector<1x256xf32>
    %27 = vector.broadcast %26 : vector<1x256xf32> to vector<4x256xf32>
    %28 = arith.mulf %25, %27 : vector<4x256xf32>
    %c3_18 = arith.constant 3 : index
    %c0_19 = arith.constant 0 : index
    %c0_20 = arith.constant 0 : index
    %29 = vector.load %arg2[%c3_18, %c0_19, %c0_20] : memref<9x8x4xf32, #tpu.memory_space<vmem>>, vector<1x8x4xf32>
    %30 = vector.shape_cast %29 : vector<1x8x4xf32> to vector<8x4xf32>
    %cst_21 = arith.constant dense<0.000000e+00> : vector<8x256xf32>
    %31 = tpu.matmul %30, %28, %cst_21 {dimension_numbers = #tpu.dot_dimension_numbers<[1], [0], [0], [1], [0, 0, 1, 1], [], []>} : vector<8x4xf32>, vector<4x256xf32>, vector<8x256xf32> -> vector<8x256xf32>
    %32 = arith.addf %24, %31 : vector<8x256xf32>
    %c4 = arith.constant 4 : index
    %c0_22 = arith.constant 0 : index
    %c0_23 = arith.constant 0 : index
    %33 = vector.load %arg2[%c4, %c0_22, %c0_23] : memref<9x8x4xf32, #tpu.memory_space<vmem>>, vector<1x8x4xf32>
    %34 = vector.shape_cast %33 : vector<1x8x4xf32> to vector<8x4xf32>
    %cst_24 = arith.constant dense<0.000000e+00> : vector<8x256xf32>
    %35 = tpu.matmul %34, %1, %cst_24 {dimension_numbers = #tpu.dot_dimension_numbers<[1], [0], [0], [1], [0, 0, 1, 1], [], []>} : vector<8x4xf32>, vector<4x256xf32>, vector<8x256xf32> -> vector<8x256xf32>
    %36 = arith.addf %32, %35 : vector<8x256xf32>
    %c255_i32 = arith.constant 255 : i32
    %37 = tpu.dynamic_rotate %1 by %c255_i32 dim 1 : vector<4x256xf32>, i32 -> vector<4x256xf32>
    %c5 = arith.constant 5 : index
    %c0_25 = arith.constant 0 : index
    %38 = vector.load %arg3[%c5, %c0_25] : memref<9x256xf32, #tpu.memory_space<vmem>>, vector<1x256xf32>
    %39 = vector.broadcast %38 : vector<1x256xf32> to vector<4x256xf32>
    %40 = arith.mulf %37, %39 : vector<4x256xf32>
    %c5_26 = arith.constant 5 : index
    %c0_27 = arith.constant 0 : index
    %c0_28 = arith.constant 0 : index
    %41 = vector.load %arg2[%c5_26, %c0_27, %c0_28] : memref<9x8x4xf32, #tpu.memory_space<vmem>>, vector<1x8x4xf32>
    %42 = vector.shape_cast %41 : vector<1x8x4xf32> to vector<8x4xf32>
    %cst_29 = arith.constant dense<0.000000e+00> : vector<8x256xf32>
    %43 = tpu.matmul %42, %40, %cst_29 {dimension_numbers = #tpu.dot_dimension_numbers<[1], [0], [0], [1], [0, 0, 1, 1], [], []>} : vector<8x4xf32>, vector<4x256xf32>, vector<8x256xf32> -> vector<8x256xf32>
    %44 = arith.addf %36, %43 : vector<8x256xf32>
    %c241_i32 = arith.constant 241 : i32
    %45 = tpu.dynamic_rotate %1 by %c241_i32 dim 1 : vector<4x256xf32>, i32 -> vector<4x256xf32>
    %c6 = arith.constant 6 : index
    %c0_30 = arith.constant 0 : index
    %46 = vector.load %arg3[%c6, %c0_30] : memref<9x256xf32, #tpu.memory_space<vmem>>, vector<1x256xf32>
    %47 = vector.broadcast %46 : vector<1x256xf32> to vector<4x256xf32>
    %48 = arith.mulf %45, %47 : vector<4x256xf32>
    %c6_31 = arith.constant 6 : index
    %c0_32 = arith.constant 0 : index
    %c0_33 = arith.constant 0 : index
    %49 = vector.load %arg2[%c6_31, %c0_32, %c0_33] : memref<9x8x4xf32, #tpu.memory_space<vmem>>, vector<1x8x4xf32>
    %50 = vector.shape_cast %49 : vector<1x8x4xf32> to vector<8x4xf32>
    %cst_34 = arith.constant dense<0.000000e+00> : vector<8x256xf32>
    %51 = tpu.matmul %50, %48, %cst_34 {dimension_numbers = #tpu.dot_dimension_numbers<[1], [0], [0], [1], [0, 0, 1, 1], [], []>} : vector<8x4xf32>, vector<4x256xf32>, vector<8x256xf32> -> vector<8x256xf32>
    %52 = arith.addf %44, %51 : vector<8x256xf32>
    %c240_i32 = arith.constant 240 : i32
    %53 = tpu.dynamic_rotate %1 by %c240_i32 dim 1 : vector<4x256xf32>, i32 -> vector<4x256xf32>
    %c7 = arith.constant 7 : index
    %c0_35 = arith.constant 0 : index
    %54 = vector.load %arg3[%c7, %c0_35] : memref<9x256xf32, #tpu.memory_space<vmem>>, vector<1x256xf32>
    %55 = vector.broadcast %54 : vector<1x256xf32> to vector<4x256xf32>
    %56 = arith.mulf %53, %55 : vector<4x256xf32>
    %c7_36 = arith.constant 7 : index
    %c0_37 = arith.constant 0 : index
    %c0_38 = arith.constant 0 : index
    %57 = vector.load %arg2[%c7_36, %c0_37, %c0_38] : memref<9x8x4xf32, #tpu.memory_space<vmem>>, vector<1x8x4xf32>
    %58 = vector.shape_cast %57 : vector<1x8x4xf32> to vector<8x4xf32>
    %cst_39 = arith.constant dense<0.000000e+00> : vector<8x256xf32>
    %59 = tpu.matmul %58, %56, %cst_39 {dimension_numbers = #tpu.dot_dimension_numbers<[1], [0], [0], [1], [0, 0, 1, 1], [], []>} : vector<8x4xf32>, vector<4x256xf32>, vector<8x256xf32> -> vector<8x256xf32>
    %60 = arith.addf %52, %59 : vector<8x256xf32>
    %c239_i32 = arith.constant 239 : i32
    %61 = tpu.dynamic_rotate %1 by %c239_i32 dim 1 : vector<4x256xf32>, i32 -> vector<4x256xf32>
    %c8 = arith.constant 8 : index
    %c0_40 = arith.constant 0 : index
    %62 = vector.load %arg3[%c8, %c0_40] : memref<9x256xf32, #tpu.memory_space<vmem>>, vector<1x256xf32>
    %63 = vector.broadcast %62 : vector<1x256xf32> to vector<4x256xf32>
    %64 = arith.mulf %61, %63 : vector<4x256xf32>
    %c8_41 = arith.constant 8 : index
    %c0_42 = arith.constant 0 : index
    %c0_43 = arith.constant 0 : index
    %65 = vector.load %arg2[%c8_41, %c0_42, %c0_43] : memref<9x8x4xf32, #tpu.memory_space<vmem>>, vector<1x8x4xf32>
    %66 = vector.shape_cast %65 : vector<1x8x4xf32> to vector<8x4xf32>
    %cst_44 = arith.constant dense<0.000000e+00> : vector<8x256xf32>
    %67 = tpu.matmul %66, %64, %cst_44 {dimension_numbers = #tpu.dot_dimension_numbers<[1], [0], [0], [1], [0, 0, 1, 1], [], []>} : vector<8x4xf32>, vector<4x256xf32>, vector<8x256xf32> -> vector<8x256xf32>
    %68 = arith.addf %60, %67 : vector<8x256xf32>
    %c0_45 = arith.constant 0 : index
    %c0_46 = arith.constant 0 : index
    %69 = vector.load %arg4[%c0_45, %c0_46] : memref<8x1xf32, #tpu.memory_space<vmem>>, vector<8x1xf32>
    %70 = vector.broadcast %69 : vector<8x1xf32> to vector<8x256xf32>
    %71 = arith.addf %68, %70 : vector<8x256xf32>
    %cst_47 = arith.constant 0.000000e+00 : f32
    %72 = vector.broadcast %cst_47 : f32 to vector<8x256xf32>
    %73 = arith.maximumf %71, %72 : vector<8x256xf32>
    %74 = vector.shape_cast %73 : vector<8x256xf32> to vector<1x8x256xf32>
    %c0_48 = arith.constant 0 : index
    %c0_49 = arith.constant 0 : index
    %c0_50 = arith.constant 0 : index
    %75 = vector.load %arg5[%c0_48, %c0_49, %c0_50] : memref<1x8x256xf32, #tpu.memory_space<vmem>>, vector<1x8x256xf32>
    tpu.vector_store %arg5[%c0_48, %c0_49, %c0_50], %74 {strides = array<i32>} : memref<1x8x256xf32, #tpu.memory_space<vmem>>, vector<1x8x256xf32>,
    return
  }
  func.func @transform_0(%arg0: i32) -> (i32, i32, i32) {
    %c0_i32 = arith.constant 0 : i32
    %c0_i32_0 = arith.constant 0 : i32
    %c0_i32_1 = arith.constant 0 : i32
    return %arg0, %c0_i32, %c0_i32_0 : i32, i32, i32
  }
  func.func @transform_1(%arg0: i32) -> (i32, i32, i32) {
    %c0_i32 = arith.constant 0 : i32
    %c0_i32_0 = arith.constant 0 : i32
    %c0_i32_1 = arith.constant 0 : i32
    %c0_i32_2 = arith.constant 0 : i32
    return %c0_i32, %c0_i32_0, %c0_i32_1 : i32, i32, i32
  }
  func.func @transform_2(%arg0: i32) -> (i32, i32) {
    %c0_i32 = arith.constant 0 : i32
    %c0_i32_0 = arith.constant 0 : i32
    %c0_i32_1 = arith.constant 0 : i32
    return %c0_i32, %c0_i32_0 : i32, i32
  }
  func.func @transform_3(%arg0: i32) -> (i32, i32) {
    %c0_i32 = arith.constant 0 : i32
    %c0_i32_0 = arith.constant 0 : i32
    %c0_i32_1 = arith.constant 0 : i32
    return %c0_i32, %c0_i32_0 : i32, i32
  }
  func.func @transform_4(%arg0: i32) -> (i32, i32, i32) {
    %c0_i32 = arith.constant 0 : i32
    %c0_i32_0 = arith.constant 0 : i32
    %c0_i32_1 = arith.constant 0 : i32
    return %arg0, %c0_i32, %c0_i32_0 : i32, i32, i32
  }
}

</mosaic_0001>

<bundles_post_ra>
// kernel: conv_block_forward.3
= control target key start
LH: loop header
LB: loop body
LE: loop exit
PB: predicated region body
PF: predicated region fallthrough
CT: control target
= control target key end

     0   :  { %s1036_s15 = smov 0   ;;  %s1163_s0 = inlined_call_operand.vmem [shape: f32[2,4,256], index: 0, kind: input, shape index: {}]   ;;  %s1164_s1 = inlined_call_operand.vmem [shape: f32[9,8,4], index: 1, kind: input, shape index: {}]   ;;  %s1165_s2 = inlined_call_operand.vmem [shape: f32[9,256], index: 2, kind: input, shape index: {}]   ;;  %s1166_s3 = inlined_call_operand.vmem [shape: f32[8,1], index: 3, kind: input, shape index: {}]   ;;  %s1167_s4 = inlined_call_operand.vmem [shape: f32[2,8,256], index: 4, kind: output, shape index: {}]  }
   0x1 LB: > { %s911_s16 = sadd.s32 4294967295, %s1000_s15   ;;  %p915_p0 = scmp.ge.s32.totalorder %s1000_s15, 1  ;;  %s1000_s15 = sphi %s1036_s15, %s14_s15  }
   0x2   : > { %p162_p1 = scmp.lt.s32.totalorder %s1000_s15, 3 }
   0x4   : > { %p163_p2 = pnand %p915_p0, %p162_p1 }
   0x5   : > { %p188_p3 = scmp.lt.s32.totalorder (!%p163_p2), %s911_s16, 1  ;;  %s1002_s21 = smov (!%p163_p2), 17  }
   0x6   : > { %166 = sbr.rel (%p163_p2) target bundleno = 340 (0x154), region = 36  ;;  %s1003_s22 = smov (!%p163_p2), 16  }
   0x7   : > { %s1004_s23 = smov (!%p163_p2), 15   ;;  %s1005_s24 = smov (!%p163_p2), 1  }
   0x8   : > { %s1006_s25 = smov (!%p163_p2), 127   ;;  %s1007_s26 = smov (!%p163_p2), 113  }
   0x9   : > { %s1008_s27 = smov (!%p163_p2), 112   ;;  %s1009_s28 = smov (!%p163_p2), 111  }
   0xb   : > { %s1169_s16 = smov (!%p188_p3, %s911_s16), 1  ;;  %v209_v19 = vlaneseq  ;;  %v214_v23 = vld [vmem:[%s1165_s2] ss:$8 sm:$0x3]  ;;  %vm250_vm1 = vcmask 1043456   ;;  %vm246_vm2 = vcmask 31744  }
   0xc   : > { %s973_s17 = sshll.u32 %s1169_s16, 3  ;;  %v216_v24 = vperm.slane %v214_v23, 0  ;;  %v217_v25 = vperm.slane %v214_v23, 1  ;;  %v222_v32 = vld [vmem:[%s1164_s1] sm:$0xff]  ;;  %v921_v47 = vld [vmem:[%s1164_s1 + $0x8] sm:$0xff]  ;;  %v931_v59 = vld [vmem:[%s1164_s1 + $0x10] sm:$0xff] }
   0xd   : > { %s192_s20 = scalar_lea.vmem %s1163_s0, %s973_s17  ;;  %v1054_v21 = vand.u32 127, %v209_v19  ;;  %v920_v33 = vld [vmem:[%s1165_s2 + $0x1] ss:$8 sm:$0x3]  ;;  %v937_v60 = vld [vmem:[%s1164_s1 + $0x18] sm:$0xff]  ;;  %v954_v19 = vld [vmem:[%s1164_s1 + $0x30] sm:$0xff] }
   0xe   : > { %v198_v0 = vld [vmem:[%s192_s20] sm:$0xff]  ;;  %v238_v36 = vperm.slane %v920_v33, 0  ;;  %v239_v37 = vperm.slane %v920_v33, 1  ;;  %s974_s17 = sshll.u32 %s1169_s16, 4 }
   0xf   : > { %200 = vst [vmem:[#allocation1] ss:$2 sm:$0xff] %v198_v0  ;;  %vm211_vm0 = vcmp.lt.s32.totalorder %v1054_v21, 17  ;;  %v930_v34 = vld [vmem:[%s1165_s2 + $0x2] ss:$8 sm:$0x3]  ;;  %s197_s20 = scalar_lea.vmem %s1167_s4, %s974_s17 }
  0x10   : > { %vm355_vm3 = vcmp.lt.s32.totalorder %v1054_v21, 15  ;;  %vm232_vm4 = vcmp.lt.s32.totalorder %v1054_v21, 16  ;;  %v361_v38 = vperm.slane %v930_v34, 0  ;;  %v362_v39 = vperm.slane %v930_v34, 1  ;;  %v942_v61 = vld [vmem:[%s1164_s1 + $0x20] sm:$0xff] }
  0x11   : > { %v936_v50 = vld [vmem:[%s1165_s2 + $0x3] ss:$8 sm:$0x3]  ;;  %vm429_vm5 = vcmp.lt.s32.totalorder %v1054_v21, 1  ;;  %vm557_vm6 = vcmp.lt.s32.totalorder %v1054_v21, 127  ;;  %vm631_vm7 = vcmp.lt.s32.totalorder %v1054_v21, 113 }
  0x12   : > { %v435_v51 = vperm.slane %v936_v50, 0  ;;  %v436_v52 = vperm.slane %v936_v50, 1  ;;  %v947_v62 = vld [vmem:[%s1165_s2 + $0x5] ss:$8 sm:$0x3]  ;;  %vm705_vm8 = vcmp.lt.s32.totalorder %v1054_v21, 112 }
  0x13   : > { %vm779_vm9 = vcmp.lt.s32.totalorder %v1054_v21, 111 }
  0x16   : > { %v201_v1 = vld.sshfl [vmem:[#allocation1] sm:$0xff pattern:$0x75316420]  ;;  %v202_v2 = vld.sshfl [vmem:[#allocation1 + $0x8] sm:$0xff pattern:$0x75316420] }
  0x17   : > { %205 = vrot.lane.b32.xlu0 %v201_v1, %s1002_s21  ;;  %223 = vst [vmem:[#allocation1] ss:$2 sm:$0xff] %v198_v0  ;;  %v563_v1 = vperm.slane %v947_v62, 0 }
  0x1e   : > { %v224_v3 = vld.sshfl [vmem:[#allocation1] sm:$0xff pattern:$0x75316420]  ;;  %v225_v4 = vld.sshfl [vmem:[#allocation1 + $0x8] sm:$0xff pattern:$0x75316420] }
  0x1f   : > { %228 = vrot.lane.b32.xlu1 %v224_v3, %s1003_s22  ;;  %207 = vrot.lane.b32.xlu0 %v202_v2, %s1002_s21  ;;  %346 = vst [vmem:[#allocation1] ss:$2 sm:$0xff] %v198_v0  ;;  %v564_v2 = vperm.slane %v947_v62, 1  ;;  %v1010_v3 = vmov 0  }
  0x20   : > { %992 = vset.pattern.permute.xlu1 %v1010_v3  ;;  %993 = vset.pattern.permute.xlu0 %v1010_v3 }
  0x26   : > { %v347_v5 = vld.sshfl [vmem:[#allocation1] sm:$0xff pattern:$0x75316420]  ;;  %v348_v6 = vld.sshfl [vmem:[#allocation1 + $0x8] sm:$0xff pattern:$0x75316420] }
  0x27   : > { %230 = vrot.lane.b32.xlu1 %v225_v4, %s1003_s22  ;;  %420 = vst [vmem:[#allocation1] ss:$2 sm:$0xff] %v198_v0  ;;  %351 = vrot.lane.b32.xlu2 %v347_v5, %s1004_s23 }
  0x2e   : > { %v422_v7 = vld.sshfl [vmem:[#allocation1 + $0x8] sm:$0xff pattern:$0x75316420]  ;;  %v421_v8 = vld.sshfl [vmem:[#allocation1] sm:$0xff pattern:$0x75316420] }
  0x2f   : > { %427 = vrot.lane.b32.xlu1 %v422_v7, %s1005_s24  ;;  %425 = vrot.lane.b32.xlu0 %v421_v8, %s1005_s24  ;;  %496 = vst [vmem:[#allocation1] ss:$2 sm:$0xff] %v198_v0 }
  0x30   : > { %353 = vrot.lane.b32.xlu2 %v348_v6, %s1004_s23 }
  0x36   : > { %v1050_v9 = vld.sshfl [vmem:[#allocation1] sm:$0xff pattern:$0x75316420]  ;;  %v1052_v10 = vld.sshfl [vmem:[#allocation1 + $0x8] sm:$0xff pattern:$0x75316420] }
  0x37   : > { %548 = vst [vmem:[#allocation1] ss:$2 sm:$0xff] %v198_v0 }
  0x3e   : > { %v550_v11 = vld.sshfl [vmem:[#allocation1 + $0x8] sm:$0xff pattern:$0x75316420]  ;;  %v549_v12 = vld.sshfl [vmem:[#allocation1] sm:$0xff pattern:$0x75316420] }
  0x3f   : > { %555 = vrot.lane.b32.xlu0 %v550_v11, %s1006_s25  ;;  %622 = vst [vmem:[#allocation1] ss:$2 sm:$0xff] %v198_v0  ;;  %553 = vrot.lane.b32.xlu2 %v549_v12, %s1006_s25 }
  0x46   : > { %v623_v13 = vld.sshfl [vmem:[#allocation1] sm:$0xff pattern:$0x75316420]  ;;  %v624_v14 = vld.sshfl [vmem:[#allocation1 + $0x8] sm:$0xff pattern:$0x75316420] }
  0x47   : > { %627 = vrot.lane.b32.xlu1 %v623_v13, %s1007_s26  ;;  %696 = vst [vmem:[#allocation1] ss:$2 sm:$0xff] %v198_v0  ;;  %629 = vrot.lane.b32.xlu2 %v624_v14, %s1007_s26 }
  0x4e   : > { %v698_v15 = vld.sshfl [vmem:[#allocation1 + $0x8] sm:$0xff pattern:$0x75316420]  ;;  %v697_v16 = vld.sshfl [vmem:[#allocation1] sm:$0xff pattern:$0x75316420] }
  0x4f   : > { %703 = vrot.lane.b32.xlu1 %v698_v15, %s1008_s27  ;;  %701 = vrot.lane.b32.xlu0 %v697_v16, %s1008_s27  ;;  %770 = vst [vmem:[#allocation1] ss:$2 sm:$0xff] %v198_v0  ;;  %v844_v0 = vld [vmem:[%s1166_s3] sm:$0xff] }
  0x56   : > { %v772_v17 = vld.sshfl [vmem:[#allocation1 + $0x8] sm:$0xff pattern:$0x75316420]  ;;  %v771_v18 = vld.sshfl [vmem:[#allocation1] sm:$0xff pattern:$0x75316420] }
  0x57   : > { %777 = vrot.lane.b32.xlu0 %v772_v17, %s1009_s28  ;;  %775 = vrot.lane.b32.xlu2 %v771_v18, %s1009_s28 }
  0x58   : > { %847 = vperm.xlu1 %992, %v844_v0  }
  0x81   : > { %v352_v22 = vpop.permute.xlu2 %351 }
  0x89   : > { %v206_v20 = vpop.permute.xlu0 %205 }
  0x8a   : > { %v354_v35 = vpop.permute.xlu2 %353 }
  0x8b   : > { %v356_v40 = vsel %vm355_vm3, %v352_v22, %v354_v35  ;;  %v357_v41 = vsel %vm355_vm3, %v354_v35, %v352_v22 }
  0x8c   : > { %v365_v48 = vmul.f32 %v361_v38, %v357_v41  ;;  %v366_v49 = vmul.f32 %v362_v39, %v356_v40  ;;  %v966_v40 = vld [vmem:[%s1164_s1 + $0x40] sm:$0xff] }
  0x91   : > { %v229_v26 = vpop.permute.xlu1 %228  ;;  %v208_v27 = vpop.permute.xlu0 %207 }
  0x92   : > { %v212_v28 = vsel %vm211_vm0, %v206_v20, %v208_v27  ;;  %v213_v29 = vsel %vm211_vm0, %v208_v27, %v206_v20  ;;  %v959_v20 = vld [vmem:[%s1165_s2 + $0x7] ss:$8 sm:$0x3] }
  0x93   : > { %v220_v30 = vmul.f32 %v216_v24, %v213_v29  ;;  %v221_v31 = vmul.f32 %v217_v25, %v212_v28  ;;  %v711_v22 = vperm.slane %v959_v20, 0  ;;  %v712_v23 = vperm.slane %v959_v20, 1 }
  0x95   : > { %926 = vmatpush.msk.msra.mxu2 %vm250_vm1, %v220_v30  ;;  %928 = vmatpush.msk.msra.mxu3 %vm250_vm1, %v221_v31  ;;  %v960_v30 = vld [vmem:[%s1164_s1 + $0x38] sm:$0xff] }
  0x96   : > { %927 = vmatmul.msk.f32.vlgmr.msra.gmra.mxu2 %vm246_vm2, %v222_v32  ;;  %929 = vmatmul.msk.f32.vlgmr.msra.gmra.mxu3 %vm246_vm2, %v222_v32  ;;  %v965_v31 = vld [vmem:[%s1165_s2 + $0x10] ss:$8 sm:$0x3] }
  0x97   : > { %v785_v32 = vperm.slane %v965_v31, 0  ;;  %v786_v33 = vperm.slane %v965_v31, 1 }
  0x99   : > { %v231_v42 = vpop.permute.xlu1 %230  ;;  %v554_v63 = vpop.permute.xlu2 %553 }
  0x9a   : > { %v233_v43 = vsel %vm232_vm4, %v229_v26, %v231_v42  ;;  %v234_v44 = vsel %vm232_vm4, %v231_v42, %v229_v26 }
  0x9b   : > { %v242_v45 = vmul.f32 %v238_v36, %v234_v44  ;;  %v243_v46 = vmul.f32 %v239_v37, %v233_v43 }
  0x9d   : > { %922 = vmatpush.msk.msra.mxu0 %vm250_vm1, %v242_v45  ;;  %924 = vmatpush.msk.msra.mxu1 %vm250_vm1, %v243_v46 }
  0x9e   : > { %923 = vmatmul.msk.f32.vlgmr.msra.gmra.mxu0 %vm246_vm2, %v921_v47  ;;  %925 = vmatmul.msk.f32.vlgmr.msra.gmra.mxu1 %vm246_vm2, %v921_v47 }
  0x9f   : > { %932 = vmatpush.msk.msrb.mxu0 %vm250_vm1, %v365_v48  ;;  %934 = vmatpush.msk.msrb.mxu1 %vm250_vm1, %v366_v49 }
  0xa1   : > { %943 = vmatpush.msk.msra.mxu0 %vm250_vm1, %v1050_v9  ;;  %945 = vmatpush.msk.msra.mxu1 %vm250_vm1, %v1052_v10  ;;  %v428_v53 = vpop.permute.xlu1 %427  ;;  %v426_v54 = vpop.permute.xlu0 %425  ;;  %v948_v9 = vld [vmem:[%s1164_s1 + $0x28] sm:$0xff] }
  0xa2   : > { %v430_v55 = vsel %vm429_vm5, %v426_v54, %v428_v53  ;;  %v431_v56 = vsel %vm429_vm5, %v428_v53, %v426_v54  ;;  %v953_v10 = vld [vmem:[%s1165_s2 + $0x6] ss:$8 sm:$0x3]  ;;  %v630_v11 = vpop.permute.xlu2 %629 }
  0xa3   : > { %v439_v57 = vmul.f32 %v435_v51, %v431_v56  ;;  %v440_v58 = vmul.f32 %v436_v52, %v430_v55  ;;  %v637_v12 = vperm.slane %v953_v10, 0  ;;  %v638_v13 = vperm.slane %v953_v10, 1 }
  0xa5   : > { %938 = vmatpush.msk.msrb.mxu2 %vm250_vm1, %v439_v57  ;;  %940 = vmatpush.msk.msrb.mxu3 %vm250_vm1, %v440_v58 }
  0xa6   : > { %933 = vmatmul.msk.f32.vlgmr.msrb.gmra.mxu0 %vm246_vm2, %v931_v59  ;;  %935 = vmatmul.msk.f32.vlgmr.msrb.gmra.mxu1 %vm246_vm2, %v931_v59 }
  0xa7   : > { %939 = vmatmul.msk.f32.vlgmr.msrb.gmra.mxu2 %vm246_vm2, %v937_v60  ;;  %941 = vmatmul.msk.f32.vlgmr.msrb.gmra.mxu3 %vm246_vm2, %v937_v60 }
  0xae   : > { %944 = vmatmul.msk.f32.vlgmr.msra.gmra.mxu0 %vm246_vm2, %v942_v61  ;;  %946 = vmatmul.msk.f32.vlgmr.msra.gmra.mxu1 %vm246_vm2, %v942_v61 }
  0xb1   : > { %v556_v4 = vpop.permute.xlu0 %555  ;;  %v776_v34 = vpop.permute.xlu2 %775 }
  0xb2   : > { %v558_v5 = vsel %vm557_vm6, %v554_v63, %v556_v4  ;;  %v559_v6 = vsel %vm557_vm6, %v556_v4, %v554_v63 }
  0xb3   : > { %v567_v7 = vmul.f32 %v563_v1, %v558_v5  ;;  %v568_v8 = vmul.f32 %v564_v2, %v559_v6 }
  0xb5   : > { %949 = vmatpush.msk.msra.mxu2 %vm250_vm1, %v567_v7  ;;  %951 = vmatpush.msk.msra.mxu3 %vm250_vm1, %v568_v8 }
  0xb6   : > { %950 = vmatmul.msk.f32.vlgmr.msra.gmra.mxu2 %vm246_vm2, %v948_v9  ;;  %952 = vmatmul.msk.f32.vlgmr.msra.gmra.mxu3 %vm246_vm2, %v948_v9 }
  0xb9   : > { %v628_v14 = vpop.permute.xlu1 %627 }
  0xba   : > { %v632_v15 = vsel %vm631_vm7, %v628_v14, %v630_v11  ;;  %v633_v16 = vsel %vm631_vm7, %v630_v11, %v628_v14 }
  0xbb   : > { %v641_v17 = vmul.f32 %v637_v12, %v632_v15  ;;  %v642_v18 = vmul.f32 %v638_v13, %v633_v16 }
  0xbd   : > { %955 = vmatpush.msk.msrb.mxu0 %vm250_vm1, %v641_v17  ;;  %957 = vmatpush.msk.msrb.mxu1 %vm250_vm1, %v642_v18 }
  0xbe   : > { %956 = vmatmul.msk.f32.vlgmr.msrb.gmra.mxu0 %vm246_vm2, %v954_v19  ;;  %958 = vmatmul.msk.f32.vlgmr.msrb.gmra.mxu1 %vm246_vm2, %v954_v19 }
  0xc1   : > { %v704_v24 = vpop.permute.xlu1 %703  ;;  %v702_v25 = vpop.permute.xlu0 %701 }
  0xc2   : > { %v706_v26 = vsel %vm705_vm8, %v702_v25, %v704_v24  ;;  %v707_v27 = vsel %vm705_vm8, %v704_v24, %v702_v25 }
  0xc3   : > { %v715_v28 = vmul.f32 %v711_v22, %v706_v26  ;;  %v716_v29 = vmul.f32 %v712_v23, %v707_v27 }
  0xc5   : > { %961 = vmatpush.msk.msrb.mxu2 %vm250_vm1, %v715_v28  ;;  %963 = vmatpush.msk.msrb.mxu3 %vm250_vm1, %v716_v29 }
  0xc6   : > { %962 = vmatmul.msk.f32.vlgmr.msrb.gmra.mxu2 %vm246_vm2, %v960_v30  ;;  %964 = vmatmul.msk.f32.vlgmr.msrb.gmra.mxu3 %vm246_vm2, %v960_v30 }
  0xc9   : > { %v778_v35 = vpop.permute.xlu0 %777 }
  0xca   : > { %v780_v36 = vsel %vm779_vm9, %v776_v34, %v778_v35  ;;  %v781_v37 = vsel %vm779_vm9, %v778_v35, %v776_v34  ;;  %v848_v6 = vpop.permute.xlu1 %847 }
  0xcb   : > { %v789_v38 = vmul.f32 %v785_v32, %v780_v36  ;;  %v790_v39 = vmul.f32 %v786_v33, %v781_v37 }
  0xcd   : > { %967 = vmatpush.msk.msra.mxu0 %vm250_vm1, %v789_v38  ;;  %969 = vmatpush.msk.msra.mxu1 %vm250_vm1, %v790_v39 }
  0xce   : > { %968 = vmatmul.msk.f32.vlgmr.msra.gmra.mxu0 %vm246_vm2, %v966_v40  ;;  %970 = vmatmul.msk.f32.vlgmr.msra.gmra.mxu1 %vm246_vm2, %v966_v40 }
 0x119   : > { %v323_v42 = vpop.f32.mrf.mxu2  ;;  %v343_v43 = vpop.f32.mrf.mxu3 }
 0x11b   : > { %v274_v21 = vpop.f32.mrf.mxu0  ;;  %v294_v41 = vpop.f32.mrf.mxu1 }
 0x11c   : > { %v324_v46 = vadd.f32 %v323_v42, %v274_v21  ;;  %v344_v47 = vadd.f32 %v343_v43, %v294_v41 }
 0x123   : > { %v395_v44 = vpop.f32.mrf.mxu0  ;;  %v415_v45 = vpop.f32.mrf.mxu1 }
 0x124   : > { %v418_v50 = vadd.f32 %v395_v44, %v324_v46  ;;  %v419_v51 = vadd.f32 %v415_v45, %v344_v47 }
 0x12a   : > { %v469_v48 = vpop.f32.mrf.mxu2  ;;  %v489_v49 = vpop.f32.mrf.mxu3 }
 0x12b   : > { %v523_v52 = vpop.f32.mrf.mxu0  ;;  %v543_v53 = vpop.f32.mrf.mxu1  ;;  %v492_v54 = vadd.f32 %v469_v48, %v418_v50  ;;  %v493_v55 = vadd.f32 %v489_v49, %v419_v51 }
 0x12d   : > { %v546_v58 = vadd.f32 %v523_v52, %v492_v54  ;;  %v547_v59 = vadd.f32 %v543_v53, %v493_v55 }
 0x139   : > { %v597_v56 = vpop.f32.mrf.mxu2  ;;  %v617_v57 = vpop.f32.mrf.mxu3 }
 0x13a   : > { %v620_v62 = vadd.f32 %v597_v56, %v546_v58  ;;  %v621_v63 = vadd.f32 %v617_v57, %v547_v59 }
 0x13b   : > { %v671_v60 = vpop.f32.mrf.mxu0  ;;  %v691_v61 = vpop.f32.mrf.mxu1 }
 0x13c   : > { %v694_v0 = vadd.f32 %v671_v60, %v620_v62  ;;  %v695_v1 = vadd.f32 %v691_v61, %v621_v63 }
 0x149   : > { %v745_v2 = vpop.f32.mrf.mxu2  ;;  %v765_v3 = vpop.f32.mrf.mxu3 }
 0x14a   : > { %v768_v4 = vadd.f32 %v745_v2, %v694_v0  ;;  %v769_v5 = vadd.f32 %v765_v3, %v695_v1 }
 0x14b   : > { %v819_v7 = vpop.f32.mrf.mxu0  ;;  %v839_v8 = vpop.f32.mrf.mxu1 }
 0x14c   : > { %v842_v9 = vadd.f32 %v819_v7, %v768_v4  ;;  %v843_v10 = vadd.f32 %v839_v8, %v769_v5 }
 0x14e   : > { %v850_v11 = vadd.f32 %v848_v6, %v842_v9  ;;  %v851_v12 = vadd.f32 %v848_v6, %v843_v10 }
 0x150   : > { %v852_v13 = vmax.f32 %v850_v11, 0.0  ;;  %v853_v14 = vmax.f32 %v851_v12, 0.0 }
 0x152   : > { %854 = vst [vmem:[%s197_s20] sm:$0xff] %v852_v13 }
 0x153   : > { %855 = vst [vmem:[%s197_s20 + $0x8] sm:$0xff] %v853_v14 }
 0x154 PF: > { %s14_s15 = sadd.s32 1, %s1000_s15  }
 0x155   : > { %p11_p4 = scmp.ge.s32.totalorder %s14_s15, 4  }
 0x157   :  { %13 = sbr.rel (!%p11_p4) target bundleno = 1 (0x1), region = 81 }

// kernel: conv_block_forward.2
= control target key start
LH: loop header
LB: loop body
LE: loop exit
PB: predicated region body
PF: predicated region fallthrough
CT: control target
= control target key end

     0   :  { %s994_s12 = smov 0   ;;  %s1121_s0 = inlined_call_operand.vmem [shape: f32[2,4,256], index: 0, kind: input, shape index: {}]   ;;  %s1122_s1 = inlined_call_operand.vmem [shape: f32[9,8,4], index: 1, kind: input, shape index: {}]   ;;  %s1123_s2 = inlined_call_operand.vmem [shape: f32[9,256], index: 2, kind: input, shape index: {}]   ;;  %s1124_s3 = inlined_call_operand.vmem [shape: f32[2,8,2], index: 3, kind: output, shape index: {}]  }
   0x1 LB: > { %s880_s13 = sadd.s32 4294967295, %s964_s12   ;;  %p884_p0 = scmp.ge.s32.totalorder %s964_s12, 1  ;;  %s964_s12 = sphi %s994_s12, %s13_s12  }
   0x2   : > { %p137_p1 = scmp.lt.s32.totalorder %s964_s12, 3 }
   0x4   : > { %p138_p2 = pnand %p884_p0, %p137_p1 }
   0x5   : > { %p160_p3 = scmp.lt.s32.totalorder (!%p138_p2), %s880_s13, 1  ;;  %s966_s18 = smov (!%p138_p2), 17  }
   0x6   : > { %141 = sbr.rel (%p138_p2) target bundleno = 455 (0x1c7), region = 32  ;;  %s967_s19 = smov (!%p138_p2), 16  }
   0x7   : > { %s968_s20 = smov (!%p138_p2), 15   ;;  %s969_s21 = smov (!%p138_p2), 1  }
   0x8   : > { %s970_s22 = smov (!%p138_p2), 127   ;;  %s971_s23 = smov (!%p138_p2), 113  }
   0x9   : > { %s972_s24 = smov (!%p138_p2), 112   ;;  %s973_s25 = smov (!%p138_p2), 111  }
   0xb   : > { %s1126_s13 = smov (!%p160_p3, %s880_s13), 1  ;;  %v180_v19 = vlaneseq  ;;  %v185_v23 = vld [vmem:[%s1123_s2] ss:$8 sm:$0x3]  ;;  %vm221_vm1 = vcmask 1043456   ;;  %vm217_vm2 = vcmask 31744  }
   0xc   : > { %s941_s14 = sshll.u32 %s1126_s13, 3  ;;  %v187_v24 = vperm.slane %v185_v23, 0  ;;  %v188_v25 = vperm.slane %v185_v23, 1  ;;  %v193_v32 = vld [vmem:[%s1122_s1] sm:$0xff]  ;;  %v889_v47 = vld [vmem:[%s1122_s1 + $0x8] sm:$0xff]  ;;  %v899_v59 = vld [vmem:[%s1122_s1 + $0x10] sm:$0xff] }
   0xd   : > { %s164_s17 = scalar_lea.vmem %s1121_s0, %s941_s14  ;;  %v1014_v21 = vand.u32 127, %v180_v19  ;;  %v888_v33 = vld [vmem:[%s1123_s2 + $0x1] ss:$8 sm:$0x3]  ;;  %v905_v60 = vld [vmem:[%s1122_s1 + $0x18] sm:$0xff]  ;;  %s168_s11 = scalar_lea.vmem %s1124_s3, %s941_s14  ;;  %vm818_vm10 = vcmask 7168  }
   0xe   : > { %v169_v0 = vld [vmem:[%s164_s17] sm:$0xff]  ;;  %v209_v36 = vperm.slane %v888_v33, 0  ;;  %v210_v37 = vperm.slane %v888_v33, 1  ;;  %vm825_vm11 = vcmask 15368  }
   0xf   : > { %171 = vst [vmem:[#allocation1] ss:$2 sm:$0xff] %v169_v0  ;;  %vm182_vm0 = vcmp.lt.s32.totalorder %v1014_v21, 17  ;;  %v898_v34 = vld [vmem:[%s1123_s2 + $0x2] ss:$8 sm:$0x3] }
  0x10   : > { %vm326_vm3 = vcmp.lt.s32.totalorder %v1014_v21, 15  ;;  %vm203_vm4 = vcmp.lt.s32.totalorder %v1014_v21, 16  ;;  %v332_v38 = vperm.slane %v898_v34, 0  ;;  %v333_v39 = vperm.slane %v898_v34, 1  ;;  %v910_v61 = vld [vmem:[%s1122_s1 + $0x20] sm:$0xff] }
  0x11   : > { %v904_v50 = vld [vmem:[%s1123_s2 + $0x3] ss:$8 sm:$0x3]  ;;  %vm400_vm5 = vcmp.lt.s32.totalorder %v1014_v21, 1  ;;  %vm528_vm6 = vcmp.lt.s32.totalorder %v1014_v21, 127  ;;  %vm602_vm7 = vcmp.lt.s32.totalorder %v1014_v21, 113 }
  0x12   : > { %v406_v51 = vperm.slane %v904_v50, 0  ;;  %v407_v52 = vperm.slane %v904_v50, 1  ;;  %v915_v62 = vld [vmem:[%s1123_s2 + $0x5] ss:$8 sm:$0x3]  ;;  %vm676_vm8 = vcmp.lt.s32.totalorder %v1014_v21, 112 }
  0x13   : > { %vm750_vm9 = vcmp.lt.s32.totalorder %v1014_v21, 111 }
  0x16   : > { %v172_v1 = vld.sshfl [vmem:[#allocation1] sm:$0xff pattern:$0x75316420]  ;;  %v173_v2 = vld.sshfl [vmem:[#allocation1 + $0x8] sm:$0xff pattern:$0x75316420] }
  0x17   : > { %176 = vrot.lane.b32.xlu0 %v172_v1, %s966_s18  ;;  %194 = vst [vmem:[#allocation1] ss:$2 sm:$0xff] %v169_v0  ;;  %v535_v1 = vperm.slane %v915_v62, 1 }
  0x1e   : > { %v195_v3 = vld.sshfl [vmem:[#allocation1] sm:$0xff pattern:$0x75316420]  ;;  %v196_v4 = vld.sshfl [vmem:[#allocation1 + $0x8] sm:$0xff pattern:$0x75316420] }
  0x1f   : > { %199 = vrot.lane.b32.xlu1 %v195_v3, %s967_s19  ;;  %178 = vrot.lane.b32.xlu0 %v173_v2, %s966_s18  ;;  %317 = vst [vmem:[#allocation1] ss:$2 sm:$0xff] %v169_v0 }
  0x26   : > { %v318_v5 = vld.sshfl [vmem:[#allocation1] sm:$0xff pattern:$0x75316420]  ;;  %v319_v6 = vld.sshfl [vmem:[#allocation1 + $0x8] sm:$0xff pattern:$0x75316420] }
  0x27   : > { %201 = vrot.lane.b32.xlu1 %v196_v4, %s967_s19  ;;  %391 = vst [vmem:[#allocation1] ss:$2 sm:$0xff] %v169_v0  ;;  %322 = vrot.lane.b32.xlu2 %v318_v5, %s968_s20 }
  0x2e   : > { %v393_v7 = vld.sshfl [vmem:[#allocation1 + $0x8] sm:$0xff pattern:$0x75316420]  ;;  %v392_v8 = vld.sshfl [vmem:[#allocation1] sm:$0xff pattern:$0x75316420] }
  0x2f   : > { %398 = vrot.lane.b32.xlu1 %v393_v7, %s969_s21  ;;  %396 = vrot.lane.b32.xlu0 %v392_v8, %s969_s21  ;;  %467 = vst [vmem:[#allocation1] ss:$2 sm:$0xff] %v169_v0  ;;  %v916_v7 = vld [vmem:[%s1122_s1 + $0x28] sm:$0xff] }
  0x30   : > { %324 = vrot.lane.b32.xlu2 %v319_v6, %s968_s20  ;;  %v921_v8 = vld [vmem:[%s1123_s2 + $0x6] ss:$8 sm:$0x3] }
  0x36   : > { %v1010_v9 = vld.sshfl [vmem:[#allocation1] sm:$0xff pattern:$0x75316420]  ;;  %v1012_v10 = vld.sshfl [vmem:[#allocation1 + $0x8] sm:$0xff pattern:$0x75316420] }
  0x37   : > { %519 = vst [vmem:[#allocation1] ss:$2 sm:$0xff] %v169_v0 }
  0x3e   : > { %v521_v11 = vld.sshfl [vmem:[#allocation1 + $0x8] sm:$0xff pattern:$0x75316420]  ;;  %v520_v12 = vld.sshfl [vmem:[#allocation1] sm:$0xff pattern:$0x75316420] }
  0x3f   : > { %526 = vrot.lane.b32.xlu0 %v521_v11, %s970_s22  ;;  %593 = vst [vmem:[#allocation1] ss:$2 sm:$0xff] %v169_v0  ;;  %524 = vrot.lane.b32.xlu2 %v520_v12, %s970_s22  ;;  %v609_v11 = vperm.slane %v921_v8, 1 }
  0x46   : > { %v594_v13 = vld.sshfl [vmem:[#allocation1] sm:$0xff pattern:$0x75316420]  ;;  %v595_v14 = vld.sshfl [vmem:[#allocation1 + $0x8] sm:$0xff pattern:$0x75316420] }
  0x47   : > { %598 = vrot.lane.b32.xlu1 %v594_v13, %s971_s23  ;;  %667 = vst [vmem:[#allocation1] ss:$2 sm:$0xff] %v169_v0  ;;  %600 = vrot.lane.b32.xlu2 %v595_v14, %s971_s23 }
  0x4e   : > { %v669_v15 = vld.sshfl [vmem:[#allocation1 + $0x8] sm:$0xff pattern:$0x75316420]  ;;  %v668_v16 = vld.sshfl [vmem:[#allocation1] sm:$0xff pattern:$0x75316420] }
  0x4f   : > { %674 = vrot.lane.b32.xlu1 %v669_v15, %s972_s24  ;;  %672 = vrot.lane.b32.xlu0 %v668_v16, %s972_s24  ;;  %741 = vst [vmem:[#allocation1] ss:$2 sm:$0xff] %v169_v0  ;;  %v534_v0 = vperm.slane %v915_v62, 0 }
  0x56   : > { %v743_v17 = vld.sshfl [vmem:[#allocation1 + $0x8] sm:$0xff pattern:$0x75316420]  ;;  %v742_v18 = vld.sshfl [vmem:[#allocation1] sm:$0xff pattern:$0x75316420] }
  0x57   : > { %748 = vrot.lane.b32.xlu0 %v743_v17, %s973_s25  ;;  %746 = vrot.lane.b32.xlu2 %v742_v18, %s973_s25  ;;  %v922_v17 = vld [vmem:[%s1122_s1 + $0x30] sm:$0xff]  ;;  %v927_v18 = vld [vmem:[%s1123_s2 + $0x7] ss:$8 sm:$0x3] }
  0x58   : > { %v682_v19 = vperm.slane %v927_v18, 0 }
  0x81   : > { %v323_v22 = vpop.permute.xlu2 %322 }
  0x89   : > { %v177_v20 = vpop.permute.xlu0 %176 }
  0x8a   : > { %v325_v35 = vpop.permute.xlu2 %324 }
  0x8b   : > { %v327_v40 = vsel %vm326_vm3, %v323_v22, %v325_v35  ;;  %v328_v41 = vsel %vm326_vm3, %v325_v35, %v323_v22 }
  0x8c   : > { %v336_v48 = vmul.f32 %v332_v38, %v328_v41  ;;  %v337_v49 = vmul.f32 %v333_v39, %v327_v40  ;;  %v934_v38 = vld [vmem:[%s1122_s1 + $0x40] sm:$0xff] }
  0x91   : > { %v200_v26 = vpop.permute.xlu1 %199  ;;  %v179_v27 = vpop.permute.xlu0 %178 }
  0x92   : > { %v183_v28 = vsel %vm182_vm0, %v177_v20, %v179_v27  ;;  %v184_v29 = vsel %vm182_vm0, %v179_v27, %v177_v20  ;;  %v683_v20 = vperm.slane %v927_v18, 1 }
  0x93   : > { %v191_v30 = vmul.f32 %v187_v24, %v184_v29  ;;  %v192_v31 = vmul.f32 %v188_v25, %v183_v28  ;;  %v928_v28 = vld [vmem:[%s1122_s1 + $0x38] sm:$0xff] }
  0x94   : > { %v933_v29 = vld [vmem:[%s1123_s2 + $0x10] ss:$8 sm:$0x3] }
  0x95   : > { %894 = vmatpush.msk.msra.mxu2 %vm221_vm1, %v191_v30  ;;  %896 = vmatpush.msk.msra.mxu3 %vm221_vm1, %v192_v31  ;;  %v756_v30 = vperm.slane %v933_v29, 0  ;;  %v757_v31 = vperm.slane %v933_v29, 1 }
  0x96   : > { %895 = vmatmul.msk.f32.vlgmr.msra.gmra.mxu2 %vm217_vm2, %v193_v32  ;;  %897 = vmatmul.msk.f32.vlgmr.msra.gmra.mxu3 %vm217_vm2, %v193_v32 }
  0x99   : > { %v202_v42 = vpop.permute.xlu1 %201  ;;  %v525_v63 = vpop.permute.xlu2 %524 }
  0x9a   : > { %v204_v43 = vsel %vm203_vm4, %v200_v26, %v202_v42  ;;  %v205_v44 = vsel %vm203_vm4, %v202_v42, %v200_v26 }
  0x9b   : > { %v213_v45 = vmul.f32 %v209_v36, %v205_v44  ;;  %v214_v46 = vmul.f32 %v210_v37, %v204_v43 }
  0x9d   : > { %890 = vmatpush.msk.msra.mxu0 %vm221_vm1, %v213_v45  ;;  %892 = vmatpush.msk.msra.mxu1 %vm221_vm1, %v214_v46 }
  0x9e   : > { %891 = vmatmul.msk.f32.vlgmr.msra.gmra.mxu0 %vm217_vm2, %v889_v47  ;;  %893 = vmatmul.msk.f32.vlgmr.msra.gmra.mxu1 %vm217_vm2, %v889_v47 }
  0x9f   : > { %900 = vmatpush.msk.msrb.mxu0 %vm221_vm1, %v336_v48  ;;  %902 = vmatpush.msk.msrb.mxu1 %vm221_vm1, %v337_v49 }
  0xa1   : > { %911 = vmatpush.msk.msra.mxu0 %vm221_vm1, %v1010_v9  ;;  %913 = vmatpush.msk.msra.mxu1 %vm221_vm1, %v1012_v10  ;;  %v399_v53 = vpop.permute.xlu1 %398  ;;  %v397_v54 = vpop.permute.xlu0 %396  ;;  %v608_v10 = vperm.slane %v921_v8, 0 }
  0xa2   : > { %v401_v55 = vsel %vm400_vm5, %v397_v54, %v399_v53  ;;  %v402_v56 = vsel %vm400_vm5, %v399_v53, %v397_v54  ;;  %v601_v9 = vpop.permute.xlu2 %600 }
  0xa3   : > { %v410_v57 = vmul.f32 %v406_v51, %v402_v56  ;;  %v411_v58 = vmul.f32 %v407_v52, %v401_v55 }
  0xa5   : > { %906 = vmatpush.msk.msrb.mxu2 %vm221_vm1, %v410_v57  ;;  %908 = vmatpush.msk.msrb.mxu3 %vm221_vm1, %v411_v58 }
  0xa6   : > { %901 = vmatmul.msk.f32.vlgmr.msrb.gmra.mxu0 %vm217_vm2, %v899_v59  ;;  %903 = vmatmul.msk.f32.vlgmr.msrb.gmra.mxu1 %vm217_vm2, %v899_v59 }
  0xa7   : > { %907 = vmatmul.msk.f32.vlgmr.msrb.gmra.mxu2 %vm217_vm2, %v905_v60  ;;  %909 = vmatmul.msk.f32.vlgmr.msrb.gmra.mxu3 %vm217_vm2, %v905_v60 }
  0xae   : > { %912 = vmatmul.msk.f32.vlgmr.msra.gmra.mxu0 %vm217_vm2, %v910_v61  ;;  %914 = vmatmul.msk.f32.vlgmr.msra.gmra.mxu1 %vm217_vm2, %v910_v61 }
  0xb1   : > { %v527_v2 = vpop.permute.xlu0 %526  ;;  %v747_v32 = vpop.permute.xlu2 %746 }
  0xb2   : > { %v529_v3 = vsel %vm528_vm6, %v525_v63, %v527_v2  ;;  %v530_v4 = vsel %vm528_vm6, %v527_v2, %v525_v63 }
  0xb3   : > { %v538_v5 = vmul.f32 %v534_v0, %v529_v3  ;;  %v539_v6 = vmul.f32 %v535_v1, %v530_v4 }
  0xb5   : > { %917 = vmatpush.msk.msra.mxu2 %vm221_vm1, %v538_v5  ;;  %919 = vmatpush.msk.msra.mxu3 %vm221_vm1, %v539_v6 }
  0xb6   : > { %918 = vmatmul.msk.f32.vlgmr.msra.gmra.mxu2 %vm217_vm2, %v916_v7  ;;  %920 = vmatmul.msk.f32.vlgmr.msra.gmra.mxu3 %vm217_vm2, %v916_v7 }
  0xb9   : > { %v599_v12 = vpop.permute.xlu1 %598 }
  0xba   : > { %v603_v13 = vsel %vm602_vm7, %v599_v12, %v601_v9  ;;  %v604_v14 = vsel %vm602_vm7, %v601_v9, %v599_v12 }
  0xbb   : > { %v612_v15 = vmul.f32 %v608_v10, %v603_v13  ;;  %v613_v16 = vmul.f32 %v609_v11, %v604_v14 }
  0xbd   : > { %923 = vmatpush.msk.msrb.mxu0 %vm221_vm1, %v612_v15  ;;  %925 = vmatpush.msk.msrb.mxu1 %vm221_vm1, %v613_v16 }
  0xbe   : > { %924 = vmatmul.msk.f32.vlgmr.msrb.gmra.mxu0 %vm217_vm2, %v922_v17  ;;  %926 = vmatmul.msk.f32.vlgmr.msrb.gmra.mxu1 %vm217_vm2, %v922_v17 }
  0xc1   : > { %v675_v22 = vpop.permute.xlu1 %674  ;;  %v673_v23 = vpop.permute.xlu0 %672 }
  0xc2   : > { %v677_v24 = vsel %vm676_vm8, %v673_v23, %v675_v22  ;;  %v678_v25 = vsel %vm676_vm8, %v675_v22, %v673_v23 }
  0xc3   : > { %v686_v26 = vmul.f32 %v682_v19, %v677_v24  ;;  %v687_v27 = vmul.f32 %v683_v20, %v678_v25 }
  0xc5   : > { %929 = vmatpush.msk.msrb.mxu2 %vm221_vm1, %v686_v26  ;;  %931 = vmatpush.msk.msrb.mxu3 %vm221_vm1, %v687_v27 }
  0xc6   : > { %930 = vmatmul.msk.f32.vlgmr.msrb.gmra.mxu2 %vm217_vm2, %v928_v28  ;;  %932 = vmatmul.msk.f32.vlgmr.msrb.gmra.mxu3 %vm217_vm2, %v928_v28 }
  0xc9   : > { %v749_v33 = vpop.permute.xlu0 %748 }
  0xca   : > { %v751_v34 = vsel %vm750_vm9, %v747_v32, %v749_v33  ;;  %v752_v35 = vsel %vm750_vm9, %v749_v33, %v747_v32 }
  0xcb   : > { %v760_v36 = vmul.f32 %v756_v30, %v751_v34  ;;  %v761_v37 = vmul.f32 %v757_v31, %v752_v35 }
  0xcd   : > { %935 = vmatpush.msk.msra.mxu0 %vm221_vm1, %v760_v36  ;;  %937 = vmatpush.msk.msra.mxu1 %vm221_vm1, %v761_v37 }
  0xce   : > { %936 = vmatmul.msk.f32.vlgmr.msra.gmra.mxu0 %vm217_vm2, %v934_v38  ;;  %938 = vmatmul.msk.f32.vlgmr.msra.gmra.mxu1 %vm217_vm2, %v934_v38 }
 0x119   : > { %v294_v40 = vpop.f32.mrf.mxu2  ;;  %v314_v41 = vpop.f32.mrf.mxu3 }
 0x11b   : > { %v245_v21 = vpop.f32.mrf.mxu0  ;;  %v265_v39 = vpop.f32.mrf.mxu1 }
 0x11c   : > { %v295_v44 = vadd.f32 %v294_v40, %v245_v21  ;;  %v315_v45 = vadd.f32 %v314_v41, %v265_v39 }
 0x123   : > { %v366_v42 = vpop.f32.mrf.mxu0  ;;  %v386_v43 = vpop.f32.mrf.mxu1 }
 0x124   : > { %v389_v48 = vadd.f32 %v366_v42, %v295_v44  ;;  %v390_v49 = vadd.f32 %v386_v43, %v315_v45 }
 0x12a   : > { %v440_v46 = vpop.f32.mrf.mxu2  ;;  %v460_v47 = vpop.f32.mrf.mxu3 }
 0x12b   : > { %v494_v50 = vpop.f32.mrf.mxu0  ;;  %v514_v51 = vpop.f32.mrf.mxu1  ;;  %v463_v52 = vadd.f32 %v440_v46, %v389_v48  ;;  %v464_v53 = vadd.f32 %v460_v47, %v390_v49 }
 0x12d   : > { %v517_v56 = vadd.f32 %v494_v50, %v463_v52  ;;  %v518_v57 = vadd.f32 %v514_v51, %v464_v53 }
 0x139   : > { %v568_v54 = vpop.f32.mrf.mxu2  ;;  %v588_v55 = vpop.f32.mrf.mxu3 }
 0x13a   : > { %v591_v60 = vadd.f32 %v568_v54, %v517_v56  ;;  %v592_v61 = vadd.f32 %v588_v55, %v518_v57 }
 0x13b   : > { %v642_v58 = vpop.f32.mrf.mxu0  ;;  %v662_v59 = vpop.f32.mrf.mxu1 }
 0x13c   : > { %v665_v62 = vadd.f32 %v642_v58, %v591_v60  ;;  %v666_v63 = vadd.f32 %v662_v59, %v592_v61 }
 0x149   : > { %v716_v0 = vpop.f32.mrf.mxu2  ;;  %v736_v1 = vpop.f32.mrf.mxu3 }
 0x14a   : > { %v739_v2 = vadd.f32 %v716_v0, %v665_v62  ;;  %v740_v3 = vadd.f32 %v736_v1, %v666_v63 }
 0x14b   : > { %v790_v4 = vpop.f32.mrf.mxu0  ;;  %v810_v5 = vpop.f32.mrf.mxu1 }
 0x14c   : > { %v813_v6 = vadd.f32 %v790_v4, %v739_v2  ;;  %v814_v7 = vadd.f32 %v810_v5, %v740_v3 }
 0x14e   : > { %v820_v8 = vmul.f32 %v813_v6, %v813_v6  ;;  %v821_v9 = vmul.f32 %v814_v7, %v814_v7  ;;  %v815_v10 = vadd.f32 %v814_v7, %v813_v6 }
 0x150   : > { %816 = vadd.xlane.f32.xlu1 %v815_v10  ;;  %v822_v11 = vadd.f32 %v821_v9, %v820_v8 }
 0x152   : > { %823 = vadd.xlane.f32.xlu2 %v822_v11 }
 0x1c3   : > { %v817_v12 = vpop.xlane.xlu1 %816 }
 0x1c4   : > { %819 = vst.msk [vmem:[%s168_s11] sm:$0xff] %vm818_vm10, %v817_v12 }
 0x1c5   : > { %v824_v13 = vpop.xlane.xlu2 %823 }
 0x1c6   : > { %826 = vst.msk [vmem:[%s168_s11] sm:$0xff] %vm825_vm11, %v824_v13 }
 0x1c7 PF: > { %s13_s12 = sadd.s32 1, %s964_s12  }
 0x1c8   : > { %p10_p4 = scmp.ge.s32.totalorder %s13_s12, 4  }
 0x1ca   :  { %12 = sbr.rel (!%p10_p4) target bundleno = 1 (0x1), region = 77 }

</bundles_post_ra>
